<compile_context>
chip_gen: v5e
topology: v5e:2x2
jax: 0.10.0
libtpu: 0.0.40
codegen_flags: <defaults>
</compile_context>

<pallas_src>
import functools

import numpy as np
import jax
import jax.numpy as jnp
from jax import lax
from jax.experimental import pallas as pl
from jax.experimental.pallas import tpu as pltpu

NBINS = 256
LANES = 128
MAX_TILE_ROWS = 1024          # (1024,128) f32 tile = 512 KiB; ~2 MiB with in+out double buffering
VMEM_LIMIT = 32 << 20         # leave headroom on v7x (64 MiB physical per TC)


def _round_up(n, m):
    return ((n + m - 1) // m) * m


# --------------------------- Pass 1: global min / max ---------------------------
def _minmax_kernel(x_ref, min_ref, max_ref, *, tm, total, has_pad):
    i = pl.program_id(0)
    x = x_ref[...]                                            # (tm, 128)
    if has_pad:
        row = lax.broadcasted_iota(jnp.int32, (tm, LANES), 0) + i * tm
        lane = lax.broadcasted_iota(jnp.int32, (tm, LANES), 1)
        valid = (row * LANES + lane) < total
        x_lo = jnp.where(valid, x, jnp.inf)
        x_hi = jnp.where(valid, x, -jnp.inf)
    else:
        x_lo = x_hi = x
    tmin = jnp.min(x_lo, keepdims=True)                       # (1, 1)
    tmax = jnp.max(x_hi, keepdims=True)                       # (1, 1)

    @pl.when(i == 0)
    def _():
        min_ref[...] = jnp.full_like(min_ref, jnp.inf)
        max_ref[...] = jnp.full_like(max_ref, -jnp.inf)

    min_ref[...] = jnp.minimum(min_ref[...], tmin)
    max_ref[...] = jnp.maximum(max_ref[...], tmax)


# ------------------- Pass 2: 256-bin histogram (per-lane partials) -------------------
def _hist_kernel(params_ref, x_ref, hist_ref, *, tm, total, has_pad):
    # params_ref: SMEM (2,) f32 = [xmin, 1/bin_width]
    # hist_ref:   (256, 128) f32 accumulator, resident across the whole grid
    i = pl.program_id(0)
    xmin = params_ref[0]
    inv_w = params_ref[1]
    bins = lax.broadcasted_iota(jnp.int32, (NBINS, LANES), 0)     # bin ids along sublanes
    if has_pad:
        lane = lax.broadcasted_iota(jnp.int32, (1, LANES), 1)

    @pl.when(i == 0)
    def _():
        hist_ref[...] = jnp.zeros_like(hist_ref)

    @pl.loop(0, tm)
    def _(r):
        xrow = x_ref[pl.ds(r, 1), :]                              # (1, 128)
        idx = jnp.clip(jnp.floor((xrow - xmin) * inv_w),
                       0.0, float(NBINS - 1)).astype(jnp.int32)
        if has_pad:
            pos = (i * tm + r) * LANES + lane
            idx = jnp.where(pos < total, idx, -1)                 # padded elems match no bin
        onehot = jnp.where(bins == idx, 1.0, 0.0)                 # (256, 128) f32, exact 0/1
        hist_ref[...] = hist_ref[...] + onehot


# ------------------- Pass 3: apply CDF (interp via one-hot MXU gather) -------------------
def _apply_kernel(params_ref, x_ref, table_ref, o_ref, *, tm):
    # table_ref: (8, 256) f32, row 0 = cdf, row 1 = cdf shifted by one bin
    xmin = params_ref[0]
    inv_w = params_ref[1]
    bins = lax.broadcasted_iota(jnp.int32, (NBINS, LANES), 0)
    table = table_ref[...]                                        # (8, 256), 2 vregs

    @pl.loop(0, tm)
    def _(r):
        xrow = x_ref[pl.ds(r, 1), :]                              # (1, 128)
        # position relative to the first bin center:  t = (x - xmin)/w - 0.5
        t = jnp.clip((xrow - xmin) * inv_w - 0.5, 0.0, float(NBINS - 1))
        idx_f = jnp.minimum(jnp.floor(t), float(NBINS - 2))
        frac = t - idx_f
        onehot = jnp.where(bins == idx_f.astype(jnp.int32), 1.0, 0.0)   # (256, 128)
        # MXU gather: (8,256) @ (256,128) -> (8,128); rows 0/1 = cdf[idx], cdf[idx+1]
        gathered = jnp.dot(table, onehot, preferred_element_type=jnp.float32)
        lo = gathered[0:1, :]
        hi = gathered[1:2, :]
        o_ref[pl.ds(r, 1), :] = (lo + frac * (hi - lo)).astype(o_ref.dtype)


# ------------------------------------ wrapper ------------------------------------
@jax.jit
def histogram_equalization(x):
    """Pallas equivalent of HistogramEqualization.forward. Returns float32 (1, *x.shape)."""
    x = jnp.asarray(x, jnp.float32)
    orig_shape = tuple(x.shape)
    total = int(np.prod(orig_shape))

    # Lane-dense tiling: (rows, 128) slab, row-tiles of at most MAX_TILE_ROWS.
    m_rows = -(-total // LANES)
    n_tiles = max(1, -(-m_rows // MAX_TILE_ROWS))
    tm = _round_up(-(-m_rows // n_tiles), 8)
    padded_rows = n_tiles * tm
    padded_total = padded_rows * LANES
    has_pad = padded_total != total

    flat = x.reshape(-1)
    if has_pad:
        flat = jnp.concatenate(
            [flat, jnp.zeros((padded_total - total,), jnp.float32)])
    x2d = flat.reshape(padded_rows, LANES)

    # ---------------- Pass 1: global min / max ----------------
    xmin_arr, xmax_arr = pl.pallas_call(
        functools.partial(_minmax_kernel, tm=tm, total=total, has_pad=has_pad),
        grid=(n_tiles,),
        in_specs=[pl.BlockSpec((tm, LANES), lambda i: (i, 0))],
        out_specs=(pl.BlockSpec((1, 1), lambda i: (0, 0)),
                   pl.BlockSpec((1, 1), lambda i: (0, 0))),
        out_shape=(jax.ShapeDtypeStruct((1, 1), jnp.float32),
                   jax.ShapeDtypeStruct((1, 1), jnp.float32)),
        compiler_params=pltpu.CompilerParams(
            dimension_semantics=("arbitrary",),
            vmem_limit_bytes=VMEM_LIMIT),
    )(x2d)
    xmin = xmin_arr[0, 0]
    xmax = xmax_arr[0, 0]

    # Degenerate (constant) image: expand the range like np.histogram does.
    degenerate = xmax <= xmin
    xmin = jnp.where(degenerate, xmin - 0.5, xmin)
    xmax = jnp.where(degenerate, xmax + 0.5, xmax)
    w = (xmax - xmin) / jnp.float32(NBINS)
    inv_w = 1.0 / w                                   # one scalar divide, hoisted out of kernels
    params = jnp.stack([xmin, inv_w])                 # -> SMEM via scalar prefetch

    # ---------------- Pass 2: histogram ----------------
    hist_lanes = pl.pallas_call(
        functools.partial(_hist_kernel, tm=tm, total=total, has_pad=has_pad),
        grid_spec=pltpu.PrefetchScalarGridSpec(
            num_scalar_prefetch=1,
            grid=(n_tiles,),
            in_specs=[pl.BlockSpec((tm, LANES), lambda i, p: (i, 0))],
            out_specs=pl.BlockSpec((NBINS, LANES), lambda i, p: (0, 0)),
        ),
        out_shape=jax.ShapeDtypeStruct((NBINS, LANES), jnp.float32),
        compiler_params=pltpu.CompilerParams(
            dimension_semantics=("arbitrary",),
            vmem_limit_bytes=VMEM_LIMIT),
    )(params, x2d)

    # 256-value CDF finalization (tiny glue in plain JAX; counts exact up to 2**31 elems).
    counts = hist_lanes.astype(jnp.int32).sum(axis=1)             # (256,) exact integers
    cdf = jnp.cumsum(counts).astype(jnp.float32) / jnp.float32(total)
    cdf = cdf.at[NBINS - 1].set(1.0)
    cdf_next = jnp.concatenate([cdf[1:], cdf[NBINS - 1:]])
    # Lane-major (8, 256) MXU operand: row 0 = cdf[idx] table, row 1 = cdf[idx+1] table.
    table = (jnp.zeros((8, NBINS), jnp.float32)
             .at[0, :].set(cdf)
             .at[1, :].set(cdf_next))

    # ---------------- Pass 3: apply ----------------
    out2d = pl.pallas_call(
        functools.partial(_apply_kernel, tm=tm),
        grid_spec=pltpu.PrefetchScalarGridSpec(
            num_scalar_prefetch=1,
            grid=(n_tiles,),
            in_specs=[pl.BlockSpec((tm, LANES), lambda i, p: (i, 0)),
                      pl.BlockSpec((8, NBINS), lambda i, p: (0, 0))],
            out_specs=pl.BlockSpec((tm, LANES), lambda i, p: (i, 0)),
        ),
        out_shape=jax.ShapeDtypeStruct((padded_rows, LANES), jnp.float32),
        compiler_params=pltpu.CompilerParams(
            dimension_semantics=("parallel",),        # independent tiles -> megacore on v7x
            vmem_limit_bytes=VMEM_LIMIT),
    )(params, x2d, table)

    out = out2d.reshape(-1)[:total].reshape((1,) + orig_shape)
    return out


# ------------------------------- numpy reference -------------------------------
def _ref_equalize_hist(x_np, nbins=NBINS):
    """Pure-numpy reference replicating skimage.exposure.equalize_hist."""
    flat = x_np.ravel()
    hist, bin_edges = np.histogram(flat, bins=nbins,
                                   range=(flat.min(), flat.max()))
    bin_centers = (bin_edges[:-1] + bin_edges[1:]) / 2.0
    cdf = hist.cumsum().astype(np.float64)
    cdf = cdf / cdf[-1]
    out = np.interp(flat, bin_centers, cdf).reshape(x_np.shape)
    return out[None, ...]


if __name__ == "__main__":
    key = jax.random.PRNGKey(0)
    x = jax.random.uniform(key, (2, 4, 16, 16), dtype=jnp.float32)

    out = histogram_equalization(x)
    out = jax.block_until_ready(out)
    assert out.shape == (1, 2, 4, 16, 16), out.shape

    ref = _ref_equalize_hist(np.asarray(x))
    np.testing.assert_allclose(np.asarray(out, dtype=np.float64), ref,
                               atol=2e-3, rtol=0)
    print("KERNEL_OK")
</pallas_src>

<mosaic_0001>
module attributes {stable_mosaic.version = 11 : i64} {
  func.func @_minmax_kernel(%arg0: i32, %arg1: memref<16x128xf32, #tpu.memory_space<vmem>>, %arg2: memref<1x1xf32, #tpu.memory_space<vmem>>, %arg3: memref<1x1xf32, #tpu.memory_space<vmem>>) attributes {dimension_semantics = [#tpu.dimension_semantics<arbitrary>], iteration_bounds = array<i64: 1>, scalar_prefetch = 0 : i64, scratch_operands = 0 : i64, tpu.core_type = #tpu.core_type<tc>, window_params = [{transform_indices = @transform_0, window_bounds = array<i64: 16, 128>}, {pipeline_mode = #tpu.pipeline_mode<synchronous>, transform_indices = @transform_1, window_bounds = array<i64: 1, 1>}, {pipeline_mode = #tpu.pipeline_mode<synchronous>, transform_indices = @transform_2, window_bounds = array<i64: 1, 1>}]} {
    %c0 = arith.constant 0 : index
    %c0_0 = arith.constant 0 : index
    %0 = vector.load %arg1[%c0, %c0_0] : memref<16x128xf32, #tpu.memory_space<vmem>>, vector<16x128xf32>
    %1 = vector.shape_cast %0 : vector<16x128xf32> to vector<1x16x128xf32>
    %cst = arith.constant dense<0x7F800000> : vector<1xf32>
    %2 = vector.multi_reduction <minimumf>, %1, %cst [1, 2] : vector<1x16x128xf32> to vector<1xf32>
    %3 = vector.shape_cast %2 : vector<1xf32> to vector<1x1x1xf32>
    %4 = vector.extract %3[0, 0, 0] : f32 from vector<1x1x1xf32>
    %5 = vector.broadcast %4 : f32 to vector<1x1xf32>
    %6 = vector.shape_cast %0 : vector<16x128xf32> to vector<1x16x128xf32>
    %cst_1 = arith.constant dense<0xFF800000> : vector<1xf32>
    %7 = vector.multi_reduction <maximumf>, %6, %cst_1 [1, 2] : vector<1x16x128xf32> to vector<1xf32>
    %8 = vector.shape_cast %7 : vector<1xf32> to vector<1x1x1xf32>
    %9 = vector.extract %8[0, 0, 0] : f32 from vector<1x1x1xf32>
    %10 = vector.broadcast %9 : f32 to vector<1x1xf32>
    %c0_i32 = arith.constant 0 : i32
    %11 = arith.cmpi eq, %arg0, %c0_i32 : i32
    %12 = arith.extui %11 : i1 to i32
    %c0_i32_2 = arith.constant 0 : i32
    %13 = arith.cmpi ne, %12, %c0_i32_2 : i32
    scf.if %13 {
      %cst_11 = arith.constant 0x7F800000 : f32
      %20 = vector.broadcast %cst_11 : f32 to vector<1x1xf32>
      %c0_12 = arith.constant 0 : index
      %c0_13 = arith.constant 0 : index
      %21 = vector.load %arg2[%c0_12, %c0_13] : memref<1x1xf32, #tpu.memory_space<vmem>>, vector<1x1xf32>
      tpu.vector_store %arg2[%c0_12, %c0_13], %20 {strides = array<i32>} : memref<1x1xf32, #tpu.memory_space<vmem>>, vector<1x1xf32>,
      %cst_14 = arith.constant 0xFF800000 : f32
      %22 = vector.broadcast %cst_14 : f32 to vector<1x1xf32>
      %c0_15 = arith.constant 0 : index
      %c0_16 = arith.constant 0 : index
      %23 = vector.load %arg3[%c0_15, %c0_16] : memref<1x1xf32, #tpu.memory_space<vmem>>, vector<1x1xf32>
      tpu.vector_store %arg3[%c0_15, %c0_16], %22 {strides = array<i32>} : memref<1x1xf32, #tpu.memory_space<vmem>>, vector<1x1xf32>,
    } else {
    }
    %c0_3 = arith.constant 0 : index
    %c0_4 = arith.constant 0 : index
    %14 = vector.load %arg2[%c0_3, %c0_4] : memref<1x1xf32, #tpu.memory_space<vmem>>, vector<1x1xf32>
    %15 = arith.minimumf %14, %5 : vector<1x1xf32>
    %c0_5 = arith.constant 0 : index
    %c0_6 = arith.constant 0 : index
    %16 = vector.load %arg2[%c0_5, %c0_6] : memref<1x1xf32, #tpu.memory_space<vmem>>, vector<1x1xf32>
    tpu.vector_store %arg2[%c0_5, %c0_6], %15 {strides = array<i32>} : memref<1x1xf32, #tpu.memory_space<vmem>>, vector<1x1xf32>,
    %c0_7 = arith.constant 0 : index
    %c0_8 = arith.constant 0 : index
    %17 = vector.load %arg3[%c0_7, %c0_8] : memref<1x1xf32, #tpu.memory_space<vmem>>, vector<1x1xf32>
    %18 = arith.maximumf %17, %10 : vector<1x1xf32>
    %c0_9 = arith.constant 0 : index
    %c0_10 = arith.constant 0 : index
    %19 = vector.load %arg3[%c0_9, %c0_10] : memref<1x1xf32, #tpu.memory_space<vmem>>, vector<1x1xf32>
    tpu.vector_store %arg3[%c0_9, %c0_10], %18 {strides = array<i32>} : memref<1x1xf32, #tpu.memory_space<vmem>>, vector<1x1xf32>,
    return
  }
  func.func @transform_0(%arg0: i32) -> (i32, i32) {
    %c0_i32 = arith.constant 0 : i32
    %c0_i32_0 = arith.constant 0 : i32
    return %arg0, %c0_i32 : i32, i32
  }
  func.func @transform_1(%arg0: i32) -> (i32, i32) {
    %c0_i32 = arith.constant 0 : i32
    %c0_i32_0 = arith.constant 0 : i32
    %c0_i32_1 = arith.constant 0 : i32
    return %c0_i32, %c0_i32_0 : i32, i32
  }
  func.func @transform_2(%arg0: i32) -> (i32, i32) {
    %c0_i32 = arith.constant 0 : i32
    %c0_i32_0 = arith.constant 0 : i32
    %c0_i32_1 = arith.constant 0 : i32
    return %c0_i32, %c0_i32_0 : i32, i32
  }
}

module attributes {stable_mosaic.version = 11 : i64} {
  func.func @_hist_kernel(%arg0: i32, %arg1: memref<2xf32, #tpu.memory_space<smem>>, %arg2: memref<16x128xf32, #tpu.memory_space<vmem>>, %arg3: memref<256x128xf32, #tpu.memory_space<vmem>>) attributes {dimension_semantics = [#tpu.dimension_semantics<arbitrary>], iteration_bounds = array<i64: 1>, scalar_prefetch = 1 : i64, scratch_operands = 0 : i64, tpu.core_type = #tpu.core_type<tc>, window_params = [{transform_indices = @transform_0, window_bounds = array<i64: 16, 128>}, {pipeline_mode = #tpu.pipeline_mode<synchronous>, transform_indices = @transform_1, window_bounds = array<i64: 256, 128>}]} {
    %c0 = arith.constant 0 : index
    %0 = memref.load %arg1[%c0] : memref<2xf32, #tpu.memory_space<smem>>
    %c1 = arith.constant 1 : index
    %1 = memref.load %arg1[%c1] : memref<2xf32, #tpu.memory_space<smem>>
    %2 = tpu.iota {dimensions = array<i32: 0>} : vector<256x128xi32>
    %c0_i32 = arith.constant 0 : i32
    %3 = arith.cmpi eq, %arg0, %c0_i32 : i32
    %4 = arith.extui %3 : i1 to i32
    %c0_i32_0 = arith.constant 0 : i32
    %5 = arith.cmpi ne, %4, %c0_i32_0 : i32
    scf.if %5 {
      %cst = arith.constant 0.000000e+00 : f32
      %7 = vector.broadcast %cst : f32 to vector<256x128xf32>
      %c0_3 = arith.constant 0 : index
      %c0_4 = arith.constant 0 : index
      %8 = vector.load %arg3[%c0_3, %c0_4] : memref<256x128xf32, #tpu.memory_space<vmem>>, vector<256x128xf32>
      tpu.vector_store %arg3[%c0_3, %c0_4], %7 {strides = array<i32>} : memref<256x128xf32, #tpu.memory_space<vmem>>, vector<256x128xf32>,
    } else {
    }
    %c0_i32_1 = arith.constant 0 : i32
    %c16_i32 = arith.constant 16 : i32
    %6 = arith.addi %c0_i32_1, %c16_i32 : i32
    %c1_i32 = arith.constant 1 : i32
    scf.for %arg4 = %c0_i32_1 to %6 step %c1_i32  : i32 {
      %c1_i32_3 = arith.constant 1 : i32
      %7 = arith.muli %arg4, %c1_i32_3 : i32
      %c0_i32_4 = arith.constant 0 : i32
      %8 = arith.addi %c0_i32_4, %7 : i32
      %9 = arith.index_cast %8 : i32 to index
      %c0_5 = arith.constant 0 : index
      %10 = vector.load %arg2[%9, %c0_5] : memref<16x128xf32, #tpu.memory_space<vmem>>, vector<1x128xf32>
      %11 = vector.broadcast %0 : f32 to vector<1x128xf32>
      %12 = arith.subf %10, %11 : vector<1x128xf32>
      %13 = vector.broadcast %1 : f32 to vector<1x128xf32>
      %14 = arith.mulf %12, %13 : vector<1x128xf32>
      %15 = math.floor %14 : vector<1x128xf32>
      %cst = arith.constant 0.000000e+00 : f32
      %cst_6 = arith.constant 2.550000e+02 : f32
      %16 = vector.broadcast %cst : f32 to vector<1x128xf32>
      %17 = arith.maximumf %16, %15 : vector<1x128xf32>
      %18 = vector.broadcast %cst_6 : f32 to vector<1x128xf32>
      %19 = arith.minimumf %18, %17 : vector<1x128xf32>
      %20 = arith.fptosi %19 : vector<1x128xf32> to vector<1x128xi32>
      %21 = vector.broadcast %20 : vector<1x128xi32> to vector<256x128xi32>
      %22 = arith.cmpi eq, %2, %21 : vector<256x128xi32>
      %cst_7 = arith.constant 1.000000e+00 : f32
      %cst_8 = arith.constant 0.000000e+00 : f32
      %23 = vector.broadcast %cst_7 : f32 to vector<256x128xf32>
      %24 = vector.broadcast %cst_8 : f32 to vector<256x128xf32>
      %25 = arith.select %22, %23, %24 : vector<256x128xi1>, vector<256x128xf32>
      %c0_9 = arith.constant 0 : index
      %c0_10 = arith.constant 0 : index
      %26 = vector.load %arg3[%c0_9, %c0_10] : memref<256x128xf32, #tpu.memory_space<vmem>>, vector<256x128xf32>
      %27 = arith.addf %26, %25 : vector<256x128xf32>
      %c0_11 = arith.constant 0 : index
      %c0_12 = arith.constant 0 : index
      %28 = vector.load %arg3[%c0_11, %c0_12] : memref<256x128xf32, #tpu.memory_space<vmem>>, vector<256x128xf32>
      tpu.vector_store %arg3[%c0_11, %c0_12], %27 {strides = array<i32>} : memref<256x128xf32, #tpu.memory_space<vmem>>, vector<256x128xf32>,
    }
    %c16_i32_2 = arith.constant 16 : i32
    return
  }
  func.func @transform_0(%arg0: i32, %arg1: memref<2xf32, #tpu.memory_space<smem>>) -> (i32, i32) {
    %c0_i32 = arith.constant 0 : i32
    %c0_i32_0 = arith.constant 0 : i32
    return %arg0, %c0_i32 : i32, i32
  }
  func.func @transform_1(%arg0: i32, %arg1: memref<2xf32, #tpu.memory_space<smem>>) -> (i32, i32) {
    %c0_i32 = arith.constant 0 : i32
    %c0_i32_0 = arith.constant 0 : i32
    %c0_i32_1 = arith.constant 0 : i32
    return %c0_i32, %c0_i32_0 : i32, i32
  }
}

module attributes {stable_mosaic.version = 11 : i64} {
  func.func @_apply_kernel(%arg0: i32, %arg1: memref<2xf32, #tpu.memory_space<smem>>, %arg2: memref<16x128xf32, #tpu.memory_space<vmem>>, %arg3: memref<8x256xf32, #tpu.memory_space<vmem>>, %arg4: memref<16x128xf32, #tpu.memory_space<vmem>>) attributes {dimension_semantics = [#tpu.dimension_semantics<parallel>], iteration_bounds = array<i64: 1>, scalar_prefetch = 1 : i64, scratch_operands = 0 : i64, tpu.core_type = #tpu.core_type<tc>, window_params = [{transform_indices = @transform_0, window_bounds = array<i64: 16, 128>}, {pipeline_mode = #tpu.pipeline_mode<synchronous>, transform_indices = @transform_1, window_bounds = array<i64: 8, 256>}, {transform_indices = @transform_2, window_bounds = array<i64: 16, 128>}]} {
    %c0 = arith.constant 0 : index
    %0 = memref.load %arg1[%c0] : memref<2xf32, #tpu.memory_space<smem>>
    %c1 = arith.constant 1 : index
    %1 = memref.load %arg1[%c1] : memref<2xf32, #tpu.memory_space<smem>>
    %2 = tpu.iota {dimensions = array<i32: 0>} : vector<256x128xi32>
    %c0_0 = arith.constant 0 : index
    %c0_1 = arith.constant 0 : index
    %3 = vector.load %arg3[%c0_0, %c0_1] : memref<8x256xf32, #tpu.memory_space<vmem>>, vector<8x256xf32>
    %c0_i32 = arith.constant 0 : i32
    %c16_i32 = arith.constant 16 : i32
    %4 = arith.addi %c0_i32, %c16_i32 : i32
    %c1_i32 = arith.constant 1 : i32
    scf.for %arg5 = %c0_i32 to %4 step %c1_i32  : i32 {
      %c1_i32_3 = arith.constant 1 : i32
      %5 = arith.muli %arg5, %c1_i32_3 : i32
      %c0_i32_4 = arith.constant 0 : i32
      %6 = arith.addi %c0_i32_4, %5 : i32
      %7 = arith.index_cast %6 : i32 to index
      %c0_5 = arith.constant 0 : index
      %8 = vector.load %arg2[%7, %c0_5] : memref<16x128xf32, #tpu.memory_space<vmem>>, vector<1x128xf32>
      %9 = vector.broadcast %0 : f32 to vector<1x128xf32>
      %10 = arith.subf %8, %9 : vector<1x128xf32>
      %11 = vector.broadcast %1 : f32 to vector<1x128xf32>
      %12 = arith.mulf %10, %11 : vector<1x128xf32>
      %cst = arith.constant 5.000000e-01 : f32
      %13 = vector.broadcast %cst : f32 to vector<1x128xf32>
      %14 = arith.subf %12, %13 : vector<1x128xf32>
      %cst_6 = arith.constant 0.000000e+00 : f32
      %cst_7 = arith.constant 2.550000e+02 : f32
      %15 = vector.broadcast %cst_6 : f32 to vector<1x128xf32>
      %16 = arith.maximumf %15, %14 : vector<1x128xf32>
      %17 = vector.broadcast %cst_7 : f32 to vector<1x128xf32>
      %18 = arith.minimumf %17, %16 : vector<1x128xf32>
      %19 = math.floor %18 : vector<1x128xf32>
      %cst_8 = arith.constant 2.540000e+02 : f32
      %20 = vector.broadcast %cst_8 : f32 to vector<1x128xf32>
      %21 = arith.minimumf %19, %20 : vector<1x128xf32>
      %22 = arith.subf %18, %21 : vector<1x128xf32>
      %23 = arith.fptosi %21 : vector<1x128xf32> to vector<1x128xi32>
      %24 = vector.broadcast %23 : vector<1x128xi32> to vector<256x128xi32>
      %25 = arith.cmpi eq, %2, %24 : vector<256x128xi32>
      %cst_9 = arith.constant 1.000000e+00 : f32
      %cst_10 = arith.constant 0.000000e+00 : f32
      %26 = vector.broadcast %cst_9 : f32 to vector<256x128xf32>
      %27 = vector.broadcast %cst_10 : f32 to vector<256x128xf32>
      %28 = arith.select %25, %26, %27 : vector<256x128xi1>, vector<256x128xf32>
      %cst_11 = arith.constant dense<0.000000e+00> : vector<8x128xf32>
      %29 = tpu.matmul %3, %28, %cst_11 {dimension_numbers = #tpu.dot_dimension_numbers<[1], [0], [0], [1], [0, 0, 1, 1], [], []>} : vector<8x256xf32>, vector<256x128xf32>, vector<8x128xf32> -> vector<8x128xf32>
      %30 = vector.extract_strided_slice %29 {offsets = [0, 0], sizes = [1, 128], strides = [1, 1]} : vector<8x128xf32> to vector<1x128xf32>
      %31 = vector.extract_strided_slice %29 {offsets = [1, 0], sizes = [1, 128], strides = [1, 1]} : vector<8x128xf32> to vector<1x128xf32>
      %32 = arith.subf %31, %30 : vector<1x128xf32>
      %33 = arith.mulf %22, %32 : vector<1x128xf32>
      %34 = arith.addf %30, %33 : vector<1x128xf32>
      %35 = arith.index_cast %6 : i32 to index
      %c0_12 = arith.constant 0 : index
      %36 = vector.load %arg4[%35, %c0_12] : memref<16x128xf32, #tpu.memory_space<vmem>>, vector<1x128xf32>
      tpu.vector_store %arg4[%35, %c0_12], %34 {strides = array<i32>} : memref<16x128xf32, #tpu.memory_space<vmem>>, vector<1x128xf32>,
    }
    %c16_i32_2 = arith.constant 16 : i32
    return
  }
  func.func @transform_0(%arg0: i32, %arg1: memref<2xf32, #tpu.memory_space<smem>>) -> (i32, i32) {
    %c0_i32 = arith.constant 0 : i32
    %c0_i32_0 = arith.constant 0 : i32
    return %arg0, %c0_i32 : i32, i32
  }
  func.func @transform_1(%arg0: i32, %arg1: memref<2xf32, #tpu.memory_space<smem>>) -> (i32, i32) {
    %c0_i32 = arith.constant 0 : i32
    %c0_i32_0 = arith.constant 0 : i32
    %c0_i32_1 = arith.constant 0 : i32
    return %c0_i32, %c0_i32_0 : i32, i32
  }
  func.func @transform_2(%arg0: i32, %arg1: memref<2xf32, #tpu.memory_space<smem>>) -> (i32, i32) {
    %c0_i32 = arith.constant 0 : i32
    %c0_i32_0 = arith.constant 0 : i32
    return %arg0, %c0_i32 : i32, i32
  }
}

</mosaic_0001>

<bundles_post_ra>
// kernel: histogram_equalization.3
= control target key start
LH: loop header
LB: loop body
LE: loop exit
PB: predicated region body
PF: predicated region fallthrough
CT: control target
= control target key end

     0   :  { %8 = vsyncpa [#allocation3], 0  ;;  %s177_s0 = inlined_call_operand.vmem [shape: f32[16,128], index: 0, kind: input, shape index: {}]   ;;  %s178_s1 = inlined_call_operand.hbm [shape: f32[1,1], index: 1, kind: output, shape index: {0}]   ;;  %s179_s2 = inlined_call_operand.hbm [shape: f32[1,1], index: 2, kind: output, shape index: {1}]  }
   0x1   :  { %v12_v0 = vld [vmem:[%s177_s0] sm:$0xff]  ;;  %v13_v1 = vld [vmem:[%s177_s0 + $0x8] sm:$0xff] }
   0x2   :  { %9 = vsyncpa [#allocation5], 0  ;;  %v14_v2 = vmin.f32 %v12_v0, %v13_v1  ;;  %v25_v3 = vmax.f32 %v12_v0, %v13_v1  ;;  %vm40_vm0 = vcmask 0   ;;  %v142_v18 = vmov inf   ;;  %s144_s0 = smov [#allocation2]   ;;  %s57_s16 = sshll.u32 %s178_s1, 4  ;;  %s58_s16 = int_to_ptr.hbm [resolvable:$true] %s57_s16 }
   0x3   :  { %41 = vst.msk [vmem:[#allocation2] sm:$0x1] %vm40_vm0, %v142_v18  ;;  %v143_v19 = vmov -inf   ;;  %s55_s13 = sshll.u32 %s144_s0, 4  ;;  %s145_s18 = smov [#allocation4]   ;;  %s56_s13 = int_to_ptr.vmem [resolvable:$true] %s55_s13 }
   0x4   :  { %15 = vmin.xlane.f32.xlu0 %v14_v2  ;;  %42 = vst.msk [vmem:[#allocation4] sm:$0x1] %vm40_vm0, %v143_v19  ;;  %s66_s19 = sshll.u32 %s145_s18, 4  ;;  %s68_s22 = sshll.u32 %s179_s2, 4  ;;  %s67_s19 = int_to_ptr.vmem [resolvable:$true] %s66_s19  ;;  %s69_s22 = int_to_ptr.hbm [resolvable:$true] %s68_s22 }
   0xa   :  { %v43_v20 = vld [vmem:[#allocation2] sm:$0x1] }
   0xb   :  { %v47_v23 = vld [vmem:[#allocation4] sm:$0x1] }
   0xc   :  { %26 = vmax.xlane.f32.xlu0 %v25_v3 }
  0x77   :  { %v16_v4 = vpop.xlane.xlu0 %15 }
  0x78   :  { %v17_v5 = vrot.slane %v16_v4, 4 }
  0x7a   :  { %v18_v6 = vmin.f32 %v16_v4, %v17_v5 }
  0x7c   :  { %v19_v7 = vrot.slane %v18_v6, 2 }
  0x7e   :  { %v20_v8 = vmin.f32 %v18_v6, %v19_v7 }
  0x7f   :  { %v27_v9 = vpop.xlane.xlu0 %26 }
  0x80   :  { %v28_v10 = vrot.slane %v27_v9, 4  ;;  %v21_v11 = vrot.slane %v20_v8, 1 }
  0x82   :  { %v29_v12 = vmax.f32 %v27_v9, %v28_v10  ;;  %v22_v13 = vmin.f32 %v20_v8, %v21_v11 }
  0x84   :  { %v30_v14 = vrot.slane %v29_v12, 2  ;;  %82 = vpush %v22_v13 }
  0x86   :  { %v31_v15 = vmax.f32 %v29_v12, %v30_v14 }
  0x88   :  { %v32_v16 = vrot.slane %v31_v15, 1 }
  0x8a   :  { %v33_v17 = vmax.f32 %v31_v15, %v32_v16 }
  0x8c   :  { %84 = vpush %v33_v17 }
  0xb5   :  { %s83_s17 = spop %82 }
  0xb6   :  { %v24_v21 = vstv %s83_s17 }
  0xb7   :  { %v44_v22 = vmin.f32 %v43_v20, %v24_v21 }
  0xb9   :  { %46 = vst.msk [vmem:[#allocation2] sm:$0x1] %vm40_vm0, %v44_v22 }
  0xba   :  { %60 = dma.vmem_to_hbm [thread:$0]  %s56_s13, 16, %s58_s16, [#allocation3]  }
  0xbd   :  { %s85_s23 = spop %84 }
  0xbe   :  { %v35_v24 = vstv %s85_s23 }
  0xbf   :  { %v48_v25 = vmax.f32 %v47_v23, %v35_v24 }
  0xc1   :  { %49 = vst.msk [vmem:[#allocation4] sm:$0x1] %vm40_vm0, %v48_v25 }
  0xc2   :  { %71 = dma.vmem_to_hbm [thread:$0]  %s67_s19, 16, %s69_s22, [#allocation5]  }
  0xc3   :  { %138 = dma.done.wait [#allocation3], 16  }
  0xc4   :  { %139 = vsyncadd [#allocation3], 4294967280 }
  0xc5   :  { %140 = dma.done.wait [#allocation5], 16  }
  0xc6   :  { %141 = vsyncadd [#allocation5], 4294967280 }
  0xc7   :  { %80 = vsyncpa [#allocation3], 1 }
  0xc8   :  { %81 = vsyncpa [#allocation5], 1 }

// kernel: histogram_equalization.4
= control target key start
LH: loop header
LB: loop body
LE: loop exit
PB: predicated region body
PF: predicated region fallthrough
CT: control target
= control target key end

     0   :  { %s311_s12 = smov [#allocation3]   ;;  %s863_s0 = inlined_call_operand.vmem [shape: f32[2], index: 0, kind: input, shape index: {}]   ;;  %s864_s1 = inlined_call_operand.vmem [shape: f32[16,128], index: 1, kind: input, shape index: {}]   ;;  %s865_s2 = inlined_call_operand.vmem [shape: f32[256,128], index: 2, kind: output, shape index: {}]  }
   0x1   :  { %s8_s11 = sshll.u32 %s863_s0, 4  ;;  %s9_s11 = int_to_ptr.vmem [resolvable:$true] %s8_s11 }
   0x2   :  { %11 = dma.vmem_to_smem %s9_s11, 16, %s311_s12, [#allocation2] }
   0x3   :  { %305 = dma.done.wait [#allocation2], 16 }
   0x4   :  { %306 = vsyncadd [#allocation2], 4294967280 }
   0x5   :  { %14 = sfence }
   0x6   :  { %s332_s13 = sld [smem:[#allocation3]]  ;;  %v19_v0 = vlaneseq  ;;  %v312_v1 = vmov 0.0   ;;  %s559_s24 = smov 0  }
   0x7   :  { %s334_s14 = sld [smem:[#allocation3 + $0x1]]  ;;  %56 = vst [vmem:[%s865_s2] sm:$0xff] %v312_v1 }
   0x8   :  { %v340_v2 = vshrl.u32 %v19_v0, 7  ;;  %57 = vst [vmem:[%s865_s2 + $0x8] sm:$0xff] %v312_v1 }
   0x9   :  { %58 = vst [vmem:[%s865_s2 + $0x10] sm:$0xff] %v312_v1 }
   0xa   :  { %v351_v3 = vadd.s32 8, %v340_v2  ;;  %v354_v4 = vadd.s32 16, %v340_v2  ;;  %v357_v5 = vadd.s32 24, %v340_v2  ;;  %v360_v6 = vadd.s32 32, %v340_v2  ;;  %59 = vst [vmem:[%s865_s2 + $0x18] sm:$0xff] %v312_v1 }
   0xb   :  { %v367_v7 = vadd.s32 40, %v340_v2  ;;  %v370_v8 = vadd.s32 48, %v340_v2  ;;  %v373_v9 = vadd.s32 56, %v340_v2  ;;  %v376_v10 = vadd.s32 64, %v340_v2  ;;  %60 = vst [vmem:[%s865_s2 + $0x20] sm:$0xff] %v312_v1 }
   0xc   :  { %v383_v11 = vadd.s32 72, %v340_v2  ;;  %v386_v12 = vadd.s32 80, %v340_v2  ;;  %v389_v13 = vadd.s32 88, %v340_v2  ;;  %v392_v14 = vadd.s32 96, %v340_v2  ;;  %61 = vst [vmem:[%s865_s2 + $0x28] sm:$0xff] %v312_v1 }
   0xd   :  { %v399_v15 = vadd.s32 104, %v340_v2  ;;  %v402_v16 = vadd.s32 112, %v340_v2  ;;  %v405_v17 = vadd.s32 120, %v340_v2  ;;  %v408_v18 = vadd.s32 128, %v340_v2  ;;  %62 = vst [vmem:[%s865_s2 + $0x30] sm:$0xff] %v312_v1 }
   0xe   :  { %v415_v19 = vadd.s32 136, %v340_v2  ;;  %v418_v20 = vadd.s32 144, %v340_v2  ;;  %v421_v21 = vadd.s32 152, %v340_v2  ;;  %v424_v22 = vadd.s32 160, %v340_v2  ;;  %63 = vst [vmem:[%s865_s2 + $0x38] sm:$0xff] %v312_v1 }
   0xf   :  { %v431_v23 = vadd.s32 168, %v340_v2  ;;  %v434_v24 = vadd.s32 176, %v340_v2  ;;  %v437_v25 = vadd.s32 184, %v340_v2  ;;  %v440_v26 = vadd.s32 192, %v340_v2  ;;  %64 = vst [vmem:[%s865_s2 + $0x40] sm:$0xff] %v312_v1 }
  0x10   :  { %v447_v27 = vadd.s32 200, %v340_v2  ;;  %v450_v28 = vadd.s32 208, %v340_v2  ;;  %v453_v29 = vadd.s32 216, %v340_v2  ;;  %v456_v30 = vadd.s32 224, %v340_v2  ;;  %65 = vst [vmem:[%s865_s2 + $0x48] sm:$0xff] %v312_v1 }
  0x11   :  { %v463_v31 = vadd.s32 232, %v340_v2  ;;  %v466_v32 = vadd.s32 240, %v340_v2  ;;  %v469_v33 = vadd.s32 248, %v340_v2  ;;  %66 = vst [vmem:[%s865_s2 + $0x50] sm:$0xff] %v312_v1 }
  0x12   :  { %67 = vst [vmem:[%s865_s2 + $0x58] sm:$0xff] %v312_v1 }
  0x13   :  { %68 = vst [vmem:[%s865_s2 + $0x60] sm:$0xff] %v312_v1 }
  0x14   :  { %69 = vst [vmem:[%s865_s2 + $0x68] sm:$0xff] %v312_v1 }
  0x15   :  { %70 = vst [vmem:[%s865_s2 + $0x70] sm:$0xff] %v312_v1 }
  0x16   :  { %71 = vst [vmem:[%s865_s2 + $0x78] sm:$0xff] %v312_v1 }
  0x17   :  { %72 = vst [vmem:[%s865_s2 + $0x80] sm:$0xff] %v312_v1 }
  0x18   :  { %73 = vst [vmem:[%s865_s2 + $0x88] sm:$0xff] %v312_v1 }
  0x19   :  { %74 = vst [vmem:[%s865_s2 + $0x90] sm:$0xff] %v312_v1 }
  0x1a   :  { %75 = vst [vmem:[%s865_s2 + $0x98] sm:$0xff] %v312_v1 }
  0x1b   :  { %76 = vst [vmem:[%s865_s2 + $0xa0] sm:$0xff] %v312_v1 }
  0x1c   :  { %77 = vst [vmem:[%s865_s2 + $0xa8] sm:$0xff] %v312_v1 }
  0x1d   :  { %78 = vst [vmem:[%s865_s2 + $0xb0] sm:$0xff] %v312_v1 }
  0x1e   :  { %79 = vst [vmem:[%s865_s2 + $0xb8] sm:$0xff] %v312_v1 }
  0x1f   :  { %80 = vst [vmem:[%s865_s2 + $0xc0] sm:$0xff] %v312_v1 }
  0x20   :  { %81 = vst [vmem:[%s865_s2 + $0xc8] sm:$0xff] %v312_v1 }
  0x21   :  { %82 = vst [vmem:[%s865_s2 + $0xd0] sm:$0xff] %v312_v1 }
  0x22   :  { %83 = vst [vmem:[%s865_s2 + $0xd8] sm:$0xff] %v312_v1 }
  0x23   :  { %84 = vst [vmem:[%s865_s2 + $0xe0] sm:$0xff] %v312_v1 }
  0x24   :  { %85 = vst [vmem:[%s865_s2 + $0xe8] sm:$0xff] %v312_v1 }
  0x25   :  { %86 = vst [vmem:[%s865_s2 + $0xf0] sm:$0xff] %v312_v1 }
  0x26   :  { %87 = vst [vmem:[%s865_s2 + $0xf8] sm:$0xff] %v312_v1 }
  0x27 LB: > { %v96_v34 = vstv %s332_s13  ;;  %s94_s27 = scalar_lea.vmem %s864_s1, %s309_s24  ;;  %v98_v36 = vstv %s334_s14  ;;  %v169_v44 = vld [vmem:[%s865_s2] sm:$0xff]  ;;  %v170_v45 = vld [vmem:[%s865_s2 + $0x8] sm:$0xff]  ;;  %v313_v48 = vmov 0.0   ;;  %s93_s24 = sadd.s32 1, %s309_s24   ;;  %s309_s24 = sphi %s559_s24, %s93_s24  }
  0x28   : > { %v95_v35 = vld [vmem:[%s94_s27] sm:$0x1]  ;;  %v171_v46 = vld [vmem:[%s865_s2 + $0x10] sm:$0xff]  ;;  %v172_v47 = vld [vmem:[%s865_s2 + $0x18] sm:$0xff]  ;;  %p90_p0 = scmp.ge.s32.totalorder %s93_s24, 16  }
  0x29   : > { %v97_v37 = vsub.f32 %v95_v35, %v96_v34  ;;  %v173_v57 = vld [vmem:[%s865_s2 + $0x20] sm:$0xff]  ;;  %v174_v58 = vld [vmem:[%s865_s2 + $0x28] sm:$0xff]  ;;  %v175_v59 = vld [vmem:[%s865_s2 + $0x30] sm:$0xff] }
  0x2a   : > { %v176_v0 = vld [vmem:[%s865_s2 + $0x38] sm:$0xff] }
  0x2b   : > { %v99_v38 = vmul.f32 %v98_v36, %v97_v37  ;;  %v177_v36 = vld [vmem:[%s865_s2 + $0x40] sm:$0xff]  ;;  %v178_v37 = vld [vmem:[%s865_s2 + $0x48] sm:$0xff] }
  0x2d   : > { %v100_v39 = vfloor.f32 %v99_v38 }
  0x2f   : > { %v101_v40 = vmax.f32 %v100_v39, 0.0 }
  0x31   : > { %v102_v41 = vmin.f32 %v101_v40, 255.0 }
  0x33   : > { %v277_v42 = vcvt.f32.s32 %v102_v41 }
  0x35   : > { %v570_v43 = vperm.slane %v277_v42, 0  ;;  %v179_v42 = vld [vmem:[%s865_s2 + $0x50] sm:$0xff] }
  0x37   : > { %vm105_vm0 = vcmp.eq.s32.totalorder %v340_v2, %v570_v43  ;;  %vm106_vm1 = vcmp.eq.s32.totalorder %v351_v3, %v570_v43  ;;  %vm107_vm2 = vcmp.eq.s32.totalorder %v354_v4, %v570_v43  ;;  %vm108_vm3 = vcmp.eq.s32.totalorder %v357_v5, %v570_v43 }
  0x38   : > { %v137_v49 = vsel %vm105_vm0, 1.0, %v313_v48  ;;  %v138_v50 = vsel %vm106_vm1, 1.0, %v313_v48  ;;  %v139_v51 = vsel %vm107_vm2, 1.0, %v313_v48  ;;  %v140_v52 = vsel %vm108_vm3, 1.0, %v313_v48 }
  0x39   : > { %v201_v53 = vadd.f32 %v169_v44, %v137_v49  ;;  %v202_v54 = vadd.f32 %v170_v45, %v138_v50  ;;  %v203_v55 = vadd.f32 %v171_v46, %v139_v51  ;;  %v204_v56 = vadd.f32 %v172_v47, %v140_v52  ;;  %v180_v47 = vld [vmem:[%s865_s2 + $0x58] sm:$0xff]  ;;  %v181_v49 = vld [vmem:[%s865_s2 + $0x60] sm:$0xff] }
  0x3a   : > { %vm109_vm4 = vcmp.eq.s32.totalorder %v360_v6, %v570_v43  ;;  %vm110_vm5 = vcmp.eq.s32.totalorder %v367_v7, %v570_v43  ;;  %vm111_vm6 = vcmp.eq.s32.totalorder %v370_v8, %v570_v43  ;;  %vm112_vm7 = vcmp.eq.s32.totalorder %v373_v9, %v570_v43 }
  0x3b   : > { %233 = vst [vmem:[%s865_s2] sm:$0xff] %v201_v53  ;;  %v141_v60 = vsel %vm109_vm4, 1.0, %v313_v48  ;;  %v142_v61 = vsel %vm110_vm5, 1.0, %v313_v48  ;;  %v143_v62 = vsel %vm111_vm6, 1.0, %v313_v48  ;;  %v144_v63 = vsel %vm112_vm7, 1.0, %v313_v48  ;;  %v182_v53 = vld [vmem:[%s865_s2 + $0x68] sm:$0xff] }
  0x3c   : > { %234 = vst [vmem:[%s865_s2 + $0x8] sm:$0xff] %v202_v54  ;;  %v205_v1 = vadd.f32 %v173_v57, %v141_v60  ;;  %v206_v34 = vadd.f32 %v174_v58, %v142_v61  ;;  %v207_v35 = vadd.f32 %v175_v59, %v143_v62  ;;  %vm113_vm8 = vcmp.eq.s32.totalorder %v376_v10, %v570_v43  ;;  %v184_v59 = vld [vmem:[%s865_s2 + $0x78] sm:$0xff]  ;;  %v185_v62 = vld [vmem:[%s865_s2 + $0x80] sm:$0xff] }
  0x3d   : > { %235 = vst [vmem:[%s865_s2 + $0x10] sm:$0xff] %v203_v55  ;;  %vm114_vm9 = vcmp.eq.s32.totalorder %v383_v11, %v570_v43  ;;  %vm115_vm10 = vcmp.eq.s32.totalorder %v386_v12, %v570_v43  ;;  %vm116_vm11 = vcmp.eq.s32.totalorder %v389_v13, %v570_v43  ;;  %v208_v38 = vadd.f32 %v176_v0, %v144_v63 }
  0x3e   : > { %236 = vst [vmem:[%s865_s2 + $0x18] sm:$0xff] %v204_v56  ;;  %v145_v39 = vsel %vm113_vm8, 1.0, %v313_v48  ;;  %v146_v40 = vsel %vm114_vm9, 1.0, %v313_v48  ;;  %v147_v41 = vsel %vm115_vm10, 1.0, %v313_v48  ;;  %v148_v46 = vsel %vm116_vm11, 1.0, %v313_v48  ;;  %v183_v56 = vld [vmem:[%s865_s2 + $0x70] sm:$0xff] }
  0x3f   : > { %237 = vst [vmem:[%s865_s2 + $0x20] sm:$0xff] %v205_v1  ;;  %v209_v44 = vadd.f32 %v177_v36, %v145_v39  ;;  %v210_v45 = vadd.f32 %v178_v37, %v146_v40  ;;  %vm117_vm12 = vcmp.eq.s32.totalorder %v392_v14, %v570_v43  ;;  %vm118_vm13 = vcmp.eq.s32.totalorder %v399_v15, %v570_v43  ;;  %v186_v1 = vld [vmem:[%s865_s2 + $0x88] sm:$0xff]  ;;  %v187_v36 = vld [vmem:[%s865_s2 + $0x90] sm:$0xff]  ;;  %v188_v39 = vld [vmem:[%s865_s2 + $0x98] sm:$0xff] }
  0x40   : > { %238 = vst [vmem:[%s865_s2 + $0x28] sm:$0xff] %v206_v34  ;;  %vm119_vm14 = vcmp.eq.s32.totalorder %v402_v16, %v570_v43  ;;  %vm120_vm15 = vcmp.eq.s32.totalorder %v405_v17, %v570_v43  ;;  %v211_v50 = vadd.f32 %v179_v42, %v147_v41  ;;  %v149_v51 = vsel %vm117_vm12, 1.0, %v313_v48  ;;  %v189_v42 = vld [vmem:[%s865_s2 + $0xa0] sm:$0xff] }
  0x41   : > { %239 = vst [vmem:[%s865_s2 + $0x30] sm:$0xff] %v207_v35  ;;  %v150_v52 = vsel %vm118_vm13, 1.0, %v313_v48  ;;  %v212_v54 = vadd.f32 %v180_v47, %v148_v46  ;;  %v151_v55 = vsel %vm119_vm14, 1.0, %v313_v48  ;;  %v152_v57 = vsel %vm120_vm15, 1.0, %v313_v48  ;;  %v190_v46 = vld [vmem:[%s865_s2 + $0xa8] sm:$0xff] }
  0x42   : > { %240 = vst [vmem:[%s865_s2 + $0x38] sm:$0xff] %v208_v38  ;;  %v213_v58 = vadd.f32 %v181_v49, %v149_v51  ;;  %vm121_vm0 = vcmp.eq.s32.totalorder %v408_v18, %v570_v43  ;;  %vm122_vm1 = vcmp.eq.s32.totalorder %v415_v19, %v570_v43  ;;  %vm123_vm2 = vcmp.eq.s32.totalorder %v418_v20, %v570_v43 }
  0x43   : > { %241 = vst [vmem:[%s865_s2 + $0x40] sm:$0xff] %v209_v44  ;;  %v214_v60 = vadd.f32 %v182_v53, %v150_v52  ;;  %v153_v61 = vsel %vm121_vm0, 1.0, %v313_v48  ;;  %vm124_vm3 = vcmp.eq.s32.totalorder %v421_v21, %v570_v43  ;;  %v215_v63 = vadd.f32 %v183_v56, %v151_v55  ;;  %v192_v53 = vld [vmem:[%s865_s2 + $0xb8] sm:$0xff]  ;;  %v193_v56 = vld [vmem:[%s865_s2 + $0xc0] sm:$0xff] }
  0x44   : > { %242 = vst [vmem:[%s865_s2 + $0x48] sm:$0xff] %v210_v45  ;;  %v154_v0 = vsel %vm122_vm1, 1.0, %v313_v48  ;;  %v216_v34 = vadd.f32 %v184_v59, %v152_v57  ;;  %v155_v35 = vsel %vm123_vm2, 1.0, %v313_v48  ;;  %vm125_vm4 = vcmp.eq.s32.totalorder %v424_v22, %v570_v43  ;;  %v194_v59 = vld [vmem:[%s865_s2 + $0xc8] sm:$0xff] }
  0x45   : > { %243 = vst [vmem:[%s865_s2 + $0x50] sm:$0xff] %v211_v50  ;;  %vm126_vm5 = vcmp.eq.s32.totalorder %v431_v23, %v570_v43  ;;  %v217_v37 = vadd.f32 %v185_v62, %v153_v61  ;;  %v156_v38 = vsel %vm124_vm3, 1.0, %v313_v48  ;;  %vm127_vm6 = vcmp.eq.s32.totalorder %v434_v24, %v570_v43  ;;  %v191_v50 = vld [vmem:[%s865_s2 + $0xb0] sm:$0xff] }
  0x46   : > { %244 = vst [vmem:[%s865_s2 + $0x58] sm:$0xff] %v212_v54  ;;  %v218_v40 = vadd.f32 %v186_v1, %v154_v0  ;;  %v157_v41 = vsel %vm125_vm4, 1.0, %v313_v48  ;;  %vm128_vm7 = vcmp.eq.s32.totalorder %v437_v25, %v570_v43  ;;  %v219_v44 = vadd.f32 %v187_v36, %v155_v35  ;;  %v195_v62 = vld [vmem:[%s865_s2 + $0xd0] sm:$0xff]  ;;  %v196_v1 = vld [vmem:[%s865_s2 + $0xd8] sm:$0xff]  ;;  %v197_v36 = vld [vmem:[%s865_s2 + $0xe0] sm:$0xff] }
  0x47   : > { %245 = vst [vmem:[%s865_s2 + $0x60] sm:$0xff] %v213_v58  ;;  %v158_v45 = vsel %vm126_vm5, 1.0, %v313_v48  ;;  %vm129_vm8 = vcmp.eq.s32.totalorder %v440_v26, %v570_v43  ;;  %v220_v47 = vadd.f32 %v188_v39, %v156_v38  ;;  %v159_v49 = vsel %vm127_vm6, 1.0, %v313_v48  ;;  %v198_v39 = vld [vmem:[%s865_s2 + $0xe8] sm:$0xff] }
  0x48   : > { %246 = vst [vmem:[%s865_s2 + $0x68] sm:$0xff] %v214_v60  ;;  %vm130_vm9 = vcmp.eq.s32.totalorder %v447_v27, %v570_v43  ;;  %v221_v51 = vadd.f32 %v189_v42, %v157_v41  ;;  %v160_v52 = vsel %vm128_vm7, 1.0, %v313_v48  ;;  %vm131_vm10 = vcmp.eq.s32.totalorder %v450_v28, %v570_v43 }
  0x49   : > { %247 = vst [vmem:[%s865_s2 + $0x70] sm:$0xff] %v215_v63  ;;  %v222_v54 = vadd.f32 %v190_v46, %v158_v45  ;;  %v161_v55 = vsel %vm129_vm8, 1.0, %v313_v48  ;;  %vm132_vm11 = vcmp.eq.s32.totalorder %v453_v29, %v570_v43  ;;  %v223_v57 = vadd.f32 %v191_v50, %v159_v49  ;;  %v200_v45 = vld [vmem:[%s865_s2 + $0xf8] sm:$0xff] }
  0x4a   : > { %248 = vst [vmem:[%s865_s2 + $0x78] sm:$0xff] %v216_v34  ;;  %v162_v58 = vsel %vm130_vm9, 1.0, %v313_v48  ;;  %vm133_vm12 = vcmp.eq.s32.totalorder %v456_v30, %v570_v43  ;;  %v224_v60 = vadd.f32 %v192_v53, %v160_v52  ;;  %v163_v61 = vsel %vm131_vm10, 1.0, %v313_v48 }
  0x4b   : > { %249 = vst [vmem:[%s865_s2 + $0x80] sm:$0xff] %v217_v37  ;;  %vm134_vm13 = vcmp.eq.s32.totalorder %v463_v31, %v570_v43  ;;  %v225_v63 = vadd.f32 %v193_v56, %v161_v55  ;;  %v164_v0 = vsel %vm132_vm11, 1.0, %v313_v48  ;;  %vm135_vm14 = vcmp.eq.s32.totalorder %v466_v32, %v570_v43 }
  0x4c   : > { %250 = vst [vmem:[%s865_s2 + $0x88] sm:$0xff] %v218_v40  ;;  %v226_v34 = vadd.f32 %v194_v59, %v162_v58  ;;  %v165_v35 = vsel %vm133_vm12, 1.0, %v313_v48  ;;  %vm136_vm15 = vcmp.eq.s32.totalorder %v469_v33, %v570_v43  ;;  %v227_v37 = vadd.f32 %v195_v62, %v163_v61  ;;  %v199_v43 = vld [vmem:[%s865_s2 + $0xf0] sm:$0xff] }
  0x4d   : > { %251 = vst [vmem:[%s865_s2 + $0x90] sm:$0xff] %v219_v44  ;;  %v166_v38 = vsel %vm134_vm13, 1.0, %v313_v48  ;;  %v228_v40 = vadd.f32 %v196_v1, %v164_v0  ;;  %v167_v41 = vsel %vm135_vm14, 1.0, %v313_v48  ;;  %v229_v42 = vadd.f32 %v197_v36, %v165_v35 }
  0x4e   : > { %252 = vst [vmem:[%s865_s2 + $0x98] sm:$0xff] %v220_v47  ;;  %v168_v44 = vsel %vm136_vm15, 1.0, %v313_v48  ;;  %v230_v46 = vadd.f32 %v198_v39, %v166_v38  ;;  %v231_v47 = vadd.f32 %v199_v43, %v167_v41 }
  0x4f   : > { %253 = vst [vmem:[%s865_s2 + $0xa0] sm:$0xff] %v221_v51  ;;  %v232_v49 = vadd.f32 %v200_v45, %v168_v44 }
  0x50   : > { %254 = vst [vmem:[%s865_s2 + $0xa8] sm:$0xff] %v222_v54 }
  0x51   : > { %255 = vst [vmem:[%s865_s2 + $0xb0] sm:$0xff] %v223_v57 }
  0x52   : > { %256 = vst [vmem:[%s865_s2 + $0xb8] sm:$0xff] %v224_v60 }
  0x53   : > { %257 = vst [vmem:[%s865_s2 + $0xc0] sm:$0xff] %v225_v63 }
  0x54   : > { %258 = vst [vmem:[%s865_s2 + $0xc8] sm:$0xff] %v226_v34 }
  0x55   : > { %259 = vst [vmem:[%s865_s2 + $0xd0] sm:$0xff] %v227_v37 }
  0x56   : > { %260 = vst [vmem:[%s865_s2 + $0xd8] sm:$0xff] %v228_v40  ;;  %92 = sbr.rel (!%p90_p0) target bundleno = 39 (0x27), region = 36 }
  0x57   : > { %261 = vst [vmem:[%s865_s2 + $0xe0] sm:$0xff] %v229_v42 }
  0x58   : > { %262 = vst [vmem:[%s865_s2 + $0xe8] sm:$0xff] %v230_v46 }
  0x59   : > { %263 = vst [vmem:[%s865_s2 + $0xf0] sm:$0xff] %v231_v47 }
  0x5a   : > { %264 = vst [vmem:[%s865_s2 + $0xf8] sm:$0xff] %v232_v49 }

// kernel: histogram_equalization.5
= control target key start
LH: loop header
LB: loop body
LE: loop exit
PB: predicated region body
PF: predicated region fallthrough
CT: control target
= control target key end

     0   :  { %s271_s15 = smov [#allocation3]   ;;  %s499_s0 = inlined_call_operand.vmem [shape: f32[2], index: 0, kind: input, shape index: {}]   ;;  %s500_s1 = inlined_call_operand.vmem [shape: f32[16,128], index: 1, kind: input, shape index: {}]   ;;  %s501_s2 = inlined_call_operand.vmem [shape: f32[8,256], index: 2, kind: input, shape index: {}]   ;;  %s502_s3 = inlined_call_operand.vmem [shape: f32[16,128], index: 3, kind: output, shape index: {}]  }
   0x1   :  { %s9_s14 = sshll.u32 %s499_s0, 4  ;;  %s10_s14 = int_to_ptr.vmem [resolvable:$true] %s9_s14 }
   0x2   :  { %12 = dma.vmem_to_smem %s10_s14, 16, %s271_s15, [#allocation2] }
   0x3   :  { %265 = dma.done.wait [#allocation2], 16 }
   0x4   :  { %266 = vsyncadd [#allocation2], 4294967280 }
   0x5   :  { %15 = sfence }
   0x6   :  { %s296_s16 = sld [smem:[#allocation3]]  ;;  %v22_v0 = vlaneseq  ;;  %v301_v1 = vld [vmem:[%s501_s2] sm:$0xff]  ;;  %v306_v2 = vld [vmem:[%s501_s2 + $0x8] sm:$0xff]  ;;  %s405_s2 = smov 0  }
   0x7   :  { %s308_s0 = sld [smem:[#allocation3 + $0x1]] }
   0x8   :  { %v310_v3 = vshrl.u32 %v22_v0, 7 }
   0xa   :  { %v313_v4 = vadd.s32 8, %v310_v3  ;;  %v316_v5 = vadd.s32 16, %v310_v3  ;;  %v319_v6 = vadd.s32 24, %v310_v3  ;;  %v322_v7 = vadd.s32 32, %v310_v3 }
   0xb   :  { %v325_v8 = vadd.s32 40, %v310_v3  ;;  %v328_v9 = vadd.s32 48, %v310_v3  ;;  %v331_v10 = vadd.s32 56, %v310_v3  ;;  %v334_v11 = vadd.s32 64, %v310_v3 }
   0xc   :  { %v337_v12 = vadd.s32 72, %v310_v3  ;;  %v340_v13 = vadd.s32 80, %v310_v3  ;;  %v343_v14 = vadd.s32 88, %v310_v3  ;;  %v346_v15 = vadd.s32 96, %v310_v3 }
   0xd   :  { %v349_v16 = vadd.s32 104, %v310_v3  ;;  %v352_v17 = vadd.s32 112, %v310_v3  ;;  %v355_v18 = vadd.s32 120, %v310_v3  ;;  %v358_v19 = vadd.s32 128, %v310_v3 }
   0xe   :  { %v361_v20 = vadd.s32 136, %v310_v3  ;;  %v364_v21 = vadd.s32 144, %v310_v3  ;;  %v367_v22 = vadd.s32 152, %v310_v3  ;;  %v370_v23 = vadd.s32 160, %v310_v3 }
   0xf   :  { %v373_v24 = vadd.s32 168, %v310_v3  ;;  %v376_v25 = vadd.s32 176, %v310_v3  ;;  %v379_v26 = vadd.s32 184, %v310_v3  ;;  %v382_v27 = vadd.s32 192, %v310_v3 }
  0x10   :  { %v385_v28 = vadd.s32 200, %v310_v3  ;;  %v388_v29 = vadd.s32 208, %v310_v3  ;;  %v391_v30 = vadd.s32 216, %v310_v3  ;;  %v394_v31 = vadd.s32 224, %v310_v3 }
  0x11   :  { %v397_v32 = vadd.s32 232, %v310_v3  ;;  %v400_v33 = vadd.s32 240, %v310_v3  ;;  %v403_v34 = vadd.s32 248, %v310_v3 }
  0x12 LB: > { %v65_v35 = vstv %s296_s16  ;;  %s63_s23 = scalar_lea.vmem %s500_s1, %s269_s2  ;;  %v67_v37 = vstv %s308_s0  ;;  %v272_v47 = vmov 1.0   ;;  %s190_s26 = scalar_lea.vmem %s502_s3, %s269_s2  ;;  %s269_s2 = sphi %s405_s2, %s62_s2  }
  0x13   : > { %v64_v36 = vld [vmem:[%s63_s23] sm:$0x1]  ;;  %s62_s2 = sadd.s32 1, %s269_s2  }
  0x14   : > { %v66_v38 = vsub.f32 %v64_v36, %v65_v35  ;;  %p59_p0 = scmp.ge.s32.totalorder %s62_s2, 16  }
  0x16   : > { %v68_v39 = vmul.f32 %v67_v37, %v66_v38 }
  0x18   : > { %v204_v40 = vadd.f32 -0.5, %v68_v39 }
  0x1a   : > { %v70_v41 = vmax.f32 %v204_v40, 0.0 }
  0x1c   : > { %v416_v42 = vmin.f32 %v70_v41, 255.0 }
  0x1e   : > { %v72_v43 = vfloor.f32 %v416_v42 }
  0x20   : > { %v419_v44 = vmin.f32 %v72_v43, 254.0 }
  0x22   : > { %v238_v45 = vcvt.f32.s32 %v419_v44  ;;  %v74_v52 = vsub.f32 %v416_v42, %v419_v44 }
  0x24   : > { %v422_v46 = vperm.slane %v238_v45, 0 }
  0x26   : > { %vm92_vm0 = vcmp.eq.s32.totalorder %v355_v18, %v422_v46  ;;  %vm108_vm1 = vcmp.eq.s32.totalorder %v403_v34, %v422_v46  ;;  %vm91_vm2 = vcmp.eq.s32.totalorder %v352_v17, %v422_v46  ;;  %vm107_vm3 = vcmp.eq.s32.totalorder %v400_v33, %v422_v46 }
  0x27   : > { %205 = vmatpush.msk.msra.mxu0 %vm92_vm0, %v272_v47  ;;  %221 = vmatpush.msk.msra.mxu1 %vm108_vm1, %v272_v47  ;;  %vm90_vm4 = vcmp.eq.s32.totalorder %v349_v16, %v422_v46  ;;  %vm106_vm5 = vcmp.eq.s32.totalorder %v397_v32, %v422_v46  ;;  %vm89_vm6 = vcmp.eq.s32.totalorder %v346_v15, %v422_v46 }
  0x28   : > { %vm105_vm7 = vcmp.eq.s32.totalorder %v394_v31, %v422_v46  ;;  %vm88_vm8 = vcmp.eq.s32.totalorder %v343_v14, %v422_v46  ;;  %vm104_vm9 = vcmp.eq.s32.totalorder %v391_v30, %v422_v46  ;;  %vm87_vm10 = vcmp.eq.s32.totalorder %v340_v13, %v422_v46 }
  0x29   : > { %206 = vmatpush.msk.msra.mxu0 %vm91_vm2, %v272_v47  ;;  %222 = vmatpush.msk.msra.mxu1 %vm107_vm3, %v272_v47  ;;  %vm103_vm11 = vcmp.eq.s32.totalorder %v388_v29, %v422_v46  ;;  %vm86_vm12 = vcmp.eq.s32.totalorder %v337_v12, %v422_v46  ;;  %vm102_vm13 = vcmp.eq.s32.totalorder %v385_v28, %v422_v46 }
  0x2a   : > { %vm85_vm14 = vcmp.eq.s32.totalorder %v334_v11, %v422_v46  ;;  %vm101_vm15 = vcmp.eq.s32.totalorder %v382_v27, %v422_v46  ;;  %vm84_vm0 = vcmp.eq.s32.totalorder %v331_v10, %v422_v46  ;;  %vm100_vm1 = vcmp.eq.s32.totalorder %v379_v26, %v422_v46 }
  0x2b   : > { %207 = vmatpush.msk.msra.mxu0 %vm90_vm4, %v272_v47  ;;  %223 = vmatpush.msk.msra.mxu1 %vm106_vm5, %v272_v47  ;;  %vm83_vm2 = vcmp.eq.s32.totalorder %v328_v9, %v422_v46  ;;  %vm99_vm3 = vcmp.eq.s32.totalorder %v376_v25, %v422_v46  ;;  %vm82_vm4 = vcmp.eq.s32.totalorder %v325_v8, %v422_v46 }
  0x2c   : > { %vm98_vm5 = vcmp.eq.s32.totalorder %v373_v24, %v422_v46 }
  0x2d   : > { %208 = vmatpush.msk.msra.mxu0 %vm89_vm6, %v272_v47  ;;  %224 = vmatpush.msk.msra.mxu1 %vm105_vm7, %v272_v47  ;;  %vm81_vm6 = vcmp.eq.s32.totalorder %v322_v7, %v422_v46  ;;  %vm97_vm7 = vcmp.eq.s32.totalorder %v370_v23, %v422_v46 }
  0x2f   : > { %209 = vmatpush.msk.msra.mxu0 %vm88_vm8, %v272_v47  ;;  %225 = vmatpush.msk.msra.mxu1 %vm104_vm9, %v272_v47  ;;  %vm80_vm8 = vcmp.eq.s32.totalorder %v319_v6, %v422_v46  ;;  %vm96_vm9 = vcmp.eq.s32.totalorder %v367_v22, %v422_v46 }
  0x31   : > { %210 = vmatpush.msk.msra.mxu0 %vm87_vm10, %v272_v47  ;;  %226 = vmatpush.msk.msra.mxu1 %vm103_vm11, %v272_v47  ;;  %vm79_vm10 = vcmp.eq.s32.totalorder %v316_v5, %v422_v46  ;;  %vm95_vm11 = vcmp.eq.s32.totalorder %v364_v21, %v422_v46 }
  0x33   : > { %211 = vmatpush.msk.msra.mxu0 %vm86_vm12, %v272_v47  ;;  %227 = vmatpush.msk.msra.mxu1 %vm102_vm13, %v272_v47  ;;  %vm78_vm12 = vcmp.eq.s32.totalorder %v313_v4, %v422_v46  ;;  %vm94_vm13 = vcmp.eq.s32.totalorder %v361_v20, %v422_v46 }
  0x35   : > { %212 = vmatpush.msk.msra.mxu0 %vm85_vm14, %v272_v47  ;;  %228 = vmatpush.msk.msra.mxu1 %vm101_vm15, %v272_v47  ;;  %vm77_vm14 = vcmp.eq.s32.totalorder %v310_v3, %v422_v46  ;;  %vm93_vm15 = vcmp.eq.s32.totalorder %v358_v19, %v422_v46 }
  0x37   : > { %213 = vmatpush.msk.msra.mxu0 %vm84_vm0, %v272_v47  ;;  %229 = vmatpush.msk.msra.mxu1 %vm100_vm1, %v272_v47 }
  0x39   : > { %214 = vmatpush.msk.msra.mxu0 %vm83_vm2, %v272_v47  ;;  %230 = vmatpush.msk.msra.mxu1 %vm99_vm3, %v272_v47 }
  0x3b   : > { %215 = vmatpush.msk.msra.mxu0 %vm82_vm4, %v272_v47  ;;  %231 = vmatpush.msk.msra.mxu1 %vm98_vm5, %v272_v47 }
  0x3d   : > { %216 = vmatpush.msk.msra.mxu0 %vm81_vm6, %v272_v47  ;;  %232 = vmatpush.msk.msra.mxu1 %vm97_vm7, %v272_v47 }
  0x3f   : > { %217 = vmatpush.msk.msra.mxu0 %vm80_vm8, %v272_v47  ;;  %233 = vmatpush.msk.msra.mxu1 %vm96_vm9, %v272_v47 }
  0x41   : > { %218 = vmatpush.msk.msra.mxu0 %vm79_vm10, %v272_v47  ;;  %234 = vmatpush.msk.msra.mxu1 %vm95_vm11, %v272_v47 }
  0x43   : > { %219 = vmatpush.msk.msra.mxu0 %vm78_vm12, %v272_v47  ;;  %235 = vmatpush.msk.msra.mxu1 %vm94_vm13, %v272_v47 }
  0x45   : > { %220 = vmatpush.msk.msra.mxu0 %vm77_vm14, %v272_v47  ;;  %236 = vmatpush.msk.msra.mxu1 %vm93_vm15, %v272_v47 }
  0x46   : > { %157 = vmatmul.f32.vlgmr.msra.gmra.mxu0 %v301_v1  ;;  %177 = vmatmul.f32.vlgmr.msra.gmra.mxu1 %v306_v2 }
  0xc3   : > { %v158_v48 = vpop.f32.mrf.mxu0  ;;  %v178_v49 = vpop.f32.mrf.mxu1 }
  0xc4   : > { %v179_v50 = vadd.f32 %v178_v49, %v158_v48 }
  0xc6   : > { %v182_v51 = vrot.slane %v179_v50, 7 }
  0xc8   : > { %v184_v53 = vsub.f32 %v179_v50, %v182_v51 }
  0xca   : > { %v186_v54 = vrot.slane %v184_v53, 1 }
  0xcc   : > { %v188_v55 = vmul.f32 %v186_v54, %v74_v52  ;;  %61 = sbr.rel (!%p59_p0) target bundleno = 18 (0x12), region = 37 }
  0xce   : > { %v189_v56 = vadd.f32 %v188_v55, %v179_v50 }
  0xd0   : > { %191 = vst [vmem:[%s190_s26] sm:$0x1] %v189_v56 }

</bundles_post_ra>
